<compile_context>
chip_gen: v7x
topology: tpu7x:2x2x1
jax: 0.10.0
libtpu: 0.0.40
codegen_flags: <defaults>
</compile_context>

<pallas_src>
import jax
import jax.numpy as jnp
from jax.experimental import pallas as pl
from jax.experimental.pallas import tpu as pltpu

BATCH = 32
STATE_DIM = 24
NDF = 64
X_SZ = STATE_DIM // 2          # number of position coordinates
BN_EPS = 1e-5
LRELU_SLOPE = 0.2


# ------------------------------------------------------------------ kernel --

def _leaky_relu(x):
    return jnp.where(x >= 0, x, LRELU_SLOPE * x)


def discriminator_kernel(x_ref, w_in_ref, b_in_ref, w_hid_ref, tab_ref, out_ref):
    """Single grid step over the full batch (preserves full-batch BN statistics).

    x_ref    : (2B, 24) f32   stacked [inp; cond]
    w_in_ref : (24, 320) bf16 [W1 | Wc1 | Wc2 | Wc3 | Wc4]   (in,out layout => x @ W)
    b_in_ref : (1, 320)  f32  [b1 | bc1 | bc2 | bc3 | bc4]
    w_hid_ref: (64, 256) bf16 [W2 | W3 | W4 | W5a]
    tab_ref  : (8, 128)  f32  rows 0-2: [b_{k+2} | gamma_{k+2}], row 3: [b5a | w5b],
                              rows 4-6: [beta_{k+2} | 0], row 7: 0
    out_ref  : (B, 1)    f32
    """
    b = x_ref.shape[0] // 2

    x = x_ref[...]                                               # (2B, 24) f32

    # --- SubtractMeanPos: applied once to the stacked [inp; cond] -----------
    col = jax.lax.broadcasted_iota(jnp.int32, x.shape, 1)
    mask = (col < X_SZ).astype(jnp.float32)
    pos_mean = jnp.sum(x * mask, axis=1, keepdims=True) * jnp.float32(1.0 / X_SZ)
    xc = x - mask * pos_mean

    # --- one fused (2B,24)@(24,320) entry matmul -----------------------------
    proj = jnp.dot(xc.astype(jnp.bfloat16), w_in_ref[...],
                   preferred_element_type=jnp.float32) + b_in_ref[...]
    h1 = proj[:b, 0 * NDF:1 * NDF]          # inp rows, layers_1 linear
    c1 = proj[b:, 1 * NDF:2 * NDF]          # cond rows, cond_enc_1..4 linears
    c2 = proj[b:, 2 * NDF:3 * NDF]
    c3 = proj[b:, 3 * NDF:4 * NDF]
    c4 = proj[b:, 4 * NDF:5 * NDF]

    y = _leaky_relu(h1) + c1

    # --- hidden blocks 2..4: Linear -> BatchNorm(train) -> LeakyReLU + cond --
    for k, c in ((0, c2), (1, c3), (2, c4)):
        h = jnp.dot(y.astype(jnp.bfloat16), w_hid_ref[:, k * NDF:(k + 1) * NDF],
                    preferred_element_type=jnp.float32) + tab_ref[k:k + 1, :NDF]
        mu = jnp.mean(h, axis=0, keepdims=True)
        var = jnp.mean(h * h, axis=0, keepdims=True) - mu * mu          # biased var
        scale = tab_ref[k:k + 1, NDF:] * jax.lax.rsqrt(var + BN_EPS)    # gamma folded
        hn = (h - mu) * scale + tab_ref[4 + k:5 + k, :NDF]
        y = _leaky_relu(hn) + c

    # --- head: Linear(64,64)+b -> LeakyReLU -> Linear(64,1, no bias) ---------
    h5 = _leaky_relu(jnp.dot(y.astype(jnp.bfloat16), w_hid_ref[:, 3 * NDF:4 * NDF],
                             preferred_element_type=jnp.float32) + tab_ref[3:4, :NDF])
    # N=1 matmul replaced by VPU multiply + lane reduction
    out_ref[...] = jnp.sum(h5 * tab_ref[3:4, NDF:], axis=-1, keepdims=True)


# ----------------------------------------------------------------- wrapper --

def pack_params(params):
    """Pack the 25 per-layer arrays into 4 lane-dense slabs. Call ONCE at init."""
    (w1, b1, wc1, bc1,
     w2, b2, g2, be2, wc2, bc2,
     w3, b3, g3, be3, wc3, bc3,
     w4, b4, g4, be4, wc4, bc4,
     w5a, b5a, w5b) = params

    w_in24 = jnp.concatenate([w1, wc1, wc2, wc3, wc4], axis=1).astype(jnp.bfloat16)  # (24,320)
    b_in24 = jnp.concatenate([b1, bc1, bc2, bc3, bc4], axis=1).astype(jnp.float32)   # (1,320)
    w_hid = jnp.concatenate([w2, w3, w4, w5a], axis=1).astype(jnp.bfloat16)          # (64,256)

    zeros = jnp.zeros((1, NDF), jnp.float32)
    tab8 = jnp.concatenate([
        jnp.concatenate([b2, g2], axis=1),
        jnp.concatenate([b3, g3], axis=1),
        jnp.concatenate([b4, g4], axis=1),
        jnp.concatenate([b5a, w5b.reshape(1, NDF)], axis=1),
        jnp.concatenate([be2, zeros], axis=1),
        jnp.concatenate([be3, zeros], axis=1),
        jnp.concatenate([be4, zeros], axis=1),
        jnp.zeros((1, 2 * NDF), jnp.float32),
    ], axis=0).astype(jnp.float32)                                                    # (8,128)

    return w_in24, b_in24, w_hid, tab8


@jax.jit
def discriminator_forward(inp, cond, w_in24, b_in24, w_hid, tab8):
    """inp, cond: (batch, STATE_DIM) f32; packed params from pack_params().
    Returns (batch, 1) f32."""
    x = jnp.concatenate([inp, cond], axis=0)               # one (2B,24) input slab
    vmem = pl.BlockSpec(memory_space=pltpu.MemorySpace.VMEM)
    return pl.pallas_call(
        discriminator_kernel,
        out_shape=jax.ShapeDtypeStruct((inp.shape[0], 1), jnp.float32),
        in_specs=[vmem] * 5,
        out_specs=vmem,
    )(x, w_in24, b_in24, w_hid, tab8)


# -------------------------------------------------- reference & params ------

def _sub_mean_pos_ref(x):
    pos = x[:, :X_SZ]
    return jnp.concatenate([pos - pos.mean(axis=1, keepdims=True), x[:, X_SZ:]], axis=1)


def _bn_train_ref(h, gamma, beta):
    mu = h.mean(axis=0, keepdims=True)
    var = ((h - mu) ** 2).mean(axis=0, keepdims=True)
    return (h - mu) / jnp.sqrt(var + BN_EPS) * gamma + beta


def discriminator_reference(inp, cond, params):
    """Pure-JAX f32 reference matching the PyTorch module (training mode)."""
    (w1, b1, wc1, bc1,
     w2, b2, g2, be2, wc2, bc2,
     w3, b3, g3, be3, wc3, bc3,
     w4, b4, g4, be4, wc4, bc4,
     w5a, b5a, w5b) = params
    lrelu = lambda x: jnp.where(x >= 0, x, LRELU_SLOPE * x)
    condc = _sub_mean_pos_ref(cond)
    y1 = lrelu(_sub_mean_pos_ref(inp) @ w1 + b1) + (condc @ wc1 + bc1)
    y2 = lrelu(_bn_train_ref(y1 @ w2 + b2, g2, be2)) + (condc @ wc2 + bc2)
    y3 = lrelu(_bn_train_ref(y2 @ w3 + b3, g3, be3)) + (condc @ wc3 + bc3)
    y4 = lrelu(_bn_train_ref(y3 @ w4 + b4, g4, be4)) + (condc @ wc4 + bc4)
    return lrelu(y4 @ w5a + b5a) @ w5b


def init_params(key):
    ks = iter(jax.random.split(key, 32))

    def rnd(shape, scale=0.1):
        return (scale * jax.random.normal(next(ks), shape)).astype(jnp.float32)

    ones = jnp.ones((1, NDF), jnp.float32)
    zeros = jnp.zeros((1, NDF), jnp.float32)

    params = [
        # layers_1 linear, cond_enc_1 linear
        rnd((STATE_DIM, NDF)), rnd((1, NDF)), rnd((STATE_DIM, NDF)), rnd((1, NDF)),
        # layers_2 linear + BN(gamma, beta), cond_enc_2 linear
        rnd((NDF, NDF)), rnd((1, NDF)), ones, zeros, rnd((STATE_DIM, NDF)), rnd((1, NDF)),
        # layers_3
        rnd((NDF, NDF)), rnd((1, NDF)), ones, zeros, rnd((STATE_DIM, NDF)), rnd((1, NDF)),
        # layers_4
        rnd((NDF, NDF)), rnd((1, NDF)), ones, zeros, rnd((STATE_DIM, NDF)), rnd((1, NDF)),
        # layers_5: Linear(64,64) w/ bias, Linear(64,1) no bias
        rnd((NDF, NDF)), rnd((1, NDF)), rnd((NDF, 1)),
    ]
    return params


if __name__ == "__main__":
    key = jax.random.PRNGKey(0)
    k_inp, k_cond, k_par = jax.random.split(key, 3)

    inp = jax.random.normal(k_inp, (BATCH, STATE_DIM), jnp.float32)
    cond = jax.random.normal(k_cond, (BATCH, STATE_DIM), jnp.float32)
    params = init_params(k_par)

    packed = pack_params(params)          # packed ONCE, reused across calls

    out = discriminator_forward(inp, cond, *packed)
    out = jax.block_until_ready(out)

    assert out.shape == (BATCH, 1) and out.dtype == jnp.float32
    assert bool(jnp.all(jnp.isfinite(out)))

    # Loose tolerance: kernel uses bf16 matmul operands (f32 accumulation).
    ref = discriminator_reference(inp, cond, params)
    max_err = float(jnp.max(jnp.abs(out - ref)))
    assert max_err < 1e-1, f"max abs error vs f32 reference too large: {max_err}"

    print("KERNEL_OK")
</pallas_src>

<mosaic_0001>
module attributes {stable_mosaic.version = 11 : i64} {
  func.func @discriminator_kernel(%arg0: memref<64x24xf32, #tpu.memory_space<vmem>>, %arg1: memref<24x320xbf16, #tpu.memory_space<vmem>>, %arg2: memref<1x320xf32, #tpu.memory_space<vmem>>, %arg3: memref<64x256xbf16, #tpu.memory_space<vmem>>, %arg4: memref<8x128xf32, #tpu.memory_space<vmem>>, %arg5: memref<32x1xf32, #tpu.memory_space<vmem>>) attributes {dimension_semantics = [], scalar_prefetch = 0 : i64, scratch_operands = 0 : i64, tpu.core_type = #tpu.core_type<tc>} {
    %c0 = arith.constant 0 : index
    %c0_0 = arith.constant 0 : index
    %0 = vector.load %arg0[%c0, %c0_0] : memref<64x24xf32, #tpu.memory_space<vmem>>, vector<64x24xf32>
    %1 = tpu.iota {dimensions = array<i32: 1>} : vector<64x24xi32>
    %c12_i32 = arith.constant 12 : i32
    %2 = vector.broadcast %c12_i32 : i32 to vector<64x24xi32>
    %3 = arith.cmpi slt, %1, %2 : vector<64x24xi32>
    %4 = arith.extui %3 : vector<64x24xi1> to vector<64x24xi32>
    %5 = arith.sitofp %4 : vector<64x24xi32> to vector<64x24xf32>
    %6 = arith.mulf %0, %5 : vector<64x24xf32>
    %cst = arith.constant dense<0.000000e+00> : vector<64xf32>
    %7 = vector.multi_reduction <add>, %6, %cst [1] : vector<64x24xf32> to vector<64xf32>
    %8 = vector.shape_cast %7 : vector<64xf32> to vector<64x1xf32>
    %cst_1 = arith.constant 0.0833333358 : f32
    %9 = vector.broadcast %cst_1 : f32 to vector<64x1xf32>
    %10 = arith.mulf %8, %9 : vector<64x1xf32>
    %11 = vector.broadcast %10 : vector<64x1xf32> to vector<64x24xf32>
    %12 = arith.mulf %5, %11 : vector<64x24xf32>
    %13 = arith.subf %0, %12 : vector<64x24xf32>
    %14 = arith.truncf %13 : vector<64x24xf32> to vector<64x24xbf16>
    %c0_2 = arith.constant 0 : index
    %c0_3 = arith.constant 0 : index
    %15 = vector.load %arg1[%c0_2, %c0_3] : memref<24x320xbf16, #tpu.memory_space<vmem>>, vector<24x320xbf16>
    %cst_4 = arith.constant dense<0.000000e+00> : vector<64x320xf32>
    %16 = tpu.matmul %14, %15, %cst_4 {dimension_numbers = #tpu.dot_dimension_numbers<[1], [0], [0], [1], [0, 0, 1, 1], [], []>} : vector<64x24xbf16>, vector<24x320xbf16>, vector<64x320xf32> -> vector<64x320xf32>
    %c0_5 = arith.constant 0 : index
    %c0_6 = arith.constant 0 : index
    %17 = vector.load %arg2[%c0_5, %c0_6] : memref<1x320xf32, #tpu.memory_space<vmem>>, vector<1x320xf32>
    %18 = vector.broadcast %17 : vector<1x320xf32> to vector<64x320xf32>
    %19 = arith.addf %16, %18 : vector<64x320xf32>
    %20 = vector.extract_strided_slice %19 {offsets = [0, 0], sizes = [32, 64], strides = [1, 1]} : vector<64x320xf32> to vector<32x64xf32>
    %21 = vector.extract_strided_slice %19 {offsets = [32, 64], sizes = [32, 64], strides = [1, 1]} : vector<64x320xf32> to vector<32x64xf32>
    %22 = vector.extract_strided_slice %19 {offsets = [32, 128], sizes = [32, 64], strides = [1, 1]} : vector<64x320xf32> to vector<32x64xf32>
    %23 = vector.extract_strided_slice %19 {offsets = [32, 192], sizes = [32, 64], strides = [1, 1]} : vector<64x320xf32> to vector<32x64xf32>
    %24 = vector.extract_strided_slice %19 {offsets = [32, 256], sizes = [32, 64], strides = [1, 1]} : vector<64x320xf32> to vector<32x64xf32>
    %cst_7 = arith.constant 0.000000e+00 : f32
    %25 = vector.broadcast %cst_7 : f32 to vector<32x64xf32>
    %26 = arith.cmpf oge, %20, %25 : vector<32x64xf32>
    %cst_8 = arith.constant 2.000000e-01 : f32
    %27 = vector.broadcast %cst_8 : f32 to vector<32x64xf32>
    %28 = arith.mulf %27, %20 : vector<32x64xf32>
    %29 = arith.select %26, %20, %28 : vector<32x64xi1>, vector<32x64xf32>
    %30 = arith.addf %29, %21 : vector<32x64xf32>
    %31 = arith.truncf %30 : vector<32x64xf32> to vector<32x64xbf16>
    %c0_9 = arith.constant 0 : index
    %c0_10 = arith.constant 0 : index
    %32 = vector.load %arg3[%c0_9, %c0_10] : memref<64x256xbf16, #tpu.memory_space<vmem>>, vector<64x64xbf16>
    %cst_11 = arith.constant dense<0.000000e+00> : vector<32x64xf32>
    %33 = tpu.matmul %31, %32, %cst_11 {dimension_numbers = #tpu.dot_dimension_numbers<[1], [0], [0], [1], [0, 0, 1, 1], [], []>} : vector<32x64xbf16>, vector<64x64xbf16>, vector<32x64xf32> -> vector<32x64xf32>
    %c0_12 = arith.constant 0 : index
    %c0_13 = arith.constant 0 : index
    %34 = vector.load %arg4[%c0_12, %c0_13] : memref<8x128xf32, #tpu.memory_space<vmem>>, vector<1x64xf32>
    %35 = vector.broadcast %34 : vector<1x64xf32> to vector<32x64xf32>
    %36 = arith.addf %33, %35 : vector<32x64xf32>
    %cst_14 = arith.constant dense<0.000000e+00> : vector<64xf32>
    %37 = vector.multi_reduction <add>, %36, %cst_14 [0] : vector<32x64xf32> to vector<64xf32>
    %38 = vector.shape_cast %37 : vector<64xf32> to vector<1x64xf32>
    %cst_15 = arith.constant 3.200000e+01 : f32
    %39 = vector.broadcast %cst_15 : f32 to vector<1x64xf32>
    %40 = arith.divf %38, %39 : vector<1x64xf32>
    %41 = arith.mulf %36, %36 : vector<32x64xf32>
    %cst_16 = arith.constant dense<0.000000e+00> : vector<64xf32>
    %42 = vector.multi_reduction <add>, %41, %cst_16 [0] : vector<32x64xf32> to vector<64xf32>
    %43 = vector.shape_cast %42 : vector<64xf32> to vector<1x64xf32>
    %cst_17 = arith.constant 3.200000e+01 : f32
    %44 = vector.broadcast %cst_17 : f32 to vector<1x64xf32>
    %45 = arith.divf %43, %44 : vector<1x64xf32>
    %46 = arith.mulf %40, %40 : vector<1x64xf32>
    %47 = arith.subf %45, %46 : vector<1x64xf32>
    %c0_18 = arith.constant 0 : index
    %c64 = arith.constant 64 : index
    %48 = vector.load %arg4[%c0_18, %c64] : memref<8x128xf32, #tpu.memory_space<vmem>>, vector<1x64xf32>
    %cst_19 = arith.constant 9.99999974E-6 : f32
    %49 = vector.broadcast %cst_19 : f32 to vector<1x64xf32>
    %50 = arith.addf %47, %49 : vector<1x64xf32>
    %51 = math.rsqrt %50 : vector<1x64xf32>
    %52 = arith.mulf %48, %51 : vector<1x64xf32>
    %53 = vector.broadcast %40 : vector<1x64xf32> to vector<32x64xf32>
    %54 = arith.subf %36, %53 : vector<32x64xf32>
    %55 = vector.broadcast %52 : vector<1x64xf32> to vector<32x64xf32>
    %56 = arith.mulf %54, %55 : vector<32x64xf32>
    %c4 = arith.constant 4 : index
    %c0_20 = arith.constant 0 : index
    %57 = vector.load %arg4[%c4, %c0_20] : memref<8x128xf32, #tpu.memory_space<vmem>>, vector<1x64xf32>
    %58 = vector.broadcast %57 : vector<1x64xf32> to vector<32x64xf32>
    %59 = arith.addf %56, %58 : vector<32x64xf32>
    %cst_21 = arith.constant 0.000000e+00 : f32
    %60 = vector.broadcast %cst_21 : f32 to vector<32x64xf32>
    %61 = arith.cmpf oge, %59, %60 : vector<32x64xf32>
    %cst_22 = arith.constant 2.000000e-01 : f32
    %62 = vector.broadcast %cst_22 : f32 to vector<32x64xf32>
    %63 = arith.mulf %62, %59 : vector<32x64xf32>
    %64 = arith.select %61, %59, %63 : vector<32x64xi1>, vector<32x64xf32>
    %65 = arith.addf %64, %22 : vector<32x64xf32>
    %66 = arith.truncf %65 : vector<32x64xf32> to vector<32x64xbf16>
    %c0_23 = arith.constant 0 : index
    %c64_24 = arith.constant 64 : index
    %67 = vector.load %arg3[%c0_23, %c64_24] : memref<64x256xbf16, #tpu.memory_space<vmem>>, vector<64x64xbf16>
    %cst_25 = arith.constant dense<0.000000e+00> : vector<32x64xf32>
    %68 = tpu.matmul %66, %67, %cst_25 {dimension_numbers = #tpu.dot_dimension_numbers<[1], [0], [0], [1], [0, 0, 1, 1], [], []>} : vector<32x64xbf16>, vector<64x64xbf16>, vector<32x64xf32> -> vector<32x64xf32>
    %c1 = arith.constant 1 : index
    %c0_26 = arith.constant 0 : index
    %69 = vector.load %arg4[%c1, %c0_26] : memref<8x128xf32, #tpu.memory_space<vmem>>, vector<1x64xf32>
    %70 = vector.broadcast %69 : vector<1x64xf32> to vector<32x64xf32>
    %71 = arith.addf %68, %70 : vector<32x64xf32>
    %cst_27 = arith.constant dense<0.000000e+00> : vector<64xf32>
    %72 = vector.multi_reduction <add>, %71, %cst_27 [0] : vector<32x64xf32> to vector<64xf32>
    %73 = vector.shape_cast %72 : vector<64xf32> to vector<1x64xf32>
    %cst_28 = arith.constant 3.200000e+01 : f32
    %74 = vector.broadcast %cst_28 : f32 to vector<1x64xf32>
    %75 = arith.divf %73, %74 : vector<1x64xf32>
    %76 = arith.mulf %71, %71 : vector<32x64xf32>
    %cst_29 = arith.constant dense<0.000000e+00> : vector<64xf32>
    %77 = vector.multi_reduction <add>, %76, %cst_29 [0] : vector<32x64xf32> to vector<64xf32>
    %78 = vector.shape_cast %77 : vector<64xf32> to vector<1x64xf32>
    %cst_30 = arith.constant 3.200000e+01 : f32
    %79 = vector.broadcast %cst_30 : f32 to vector<1x64xf32>
    %80 = arith.divf %78, %79 : vector<1x64xf32>
    %81 = arith.mulf %75, %75 : vector<1x64xf32>
    %82 = arith.subf %80, %81 : vector<1x64xf32>
    %c1_31 = arith.constant 1 : index
    %c64_32 = arith.constant 64 : index
    %83 = vector.load %arg4[%c1_31, %c64_32] : memref<8x128xf32, #tpu.memory_space<vmem>>, vector<1x64xf32>
    %cst_33 = arith.constant 9.99999974E-6 : f32
    %84 = vector.broadcast %cst_33 : f32 to vector<1x64xf32>
    %85 = arith.addf %82, %84 : vector<1x64xf32>
    %86 = math.rsqrt %85 : vector<1x64xf32>
    %87 = arith.mulf %83, %86 : vector<1x64xf32>
    %88 = vector.broadcast %75 : vector<1x64xf32> to vector<32x64xf32>
    %89 = arith.subf %71, %88 : vector<32x64xf32>
    %90 = vector.broadcast %87 : vector<1x64xf32> to vector<32x64xf32>
    %91 = arith.mulf %89, %90 : vector<32x64xf32>
    %c5 = arith.constant 5 : index
    %c0_34 = arith.constant 0 : index
    %92 = vector.load %arg4[%c5, %c0_34] : memref<8x128xf32, #tpu.memory_space<vmem>>, vector<1x64xf32>
    %93 = vector.broadcast %92 : vector<1x64xf32> to vector<32x64xf32>
    %94 = arith.addf %91, %93 : vector<32x64xf32>
    %cst_35 = arith.constant 0.000000e+00 : f32
    %95 = vector.broadcast %cst_35 : f32 to vector<32x64xf32>
    %96 = arith.cmpf oge, %94, %95 : vector<32x64xf32>
    %cst_36 = arith.constant 2.000000e-01 : f32
    %97 = vector.broadcast %cst_36 : f32 to vector<32x64xf32>
    %98 = arith.mulf %97, %94 : vector<32x64xf32>
    %99 = arith.select %96, %94, %98 : vector<32x64xi1>, vector<32x64xf32>
    %100 = arith.addf %99, %23 : vector<32x64xf32>
    %101 = arith.truncf %100 : vector<32x64xf32> to vector<32x64xbf16>
    %c0_37 = arith.constant 0 : index
    %c128 = arith.constant 128 : index
    %102 = vector.load %arg3[%c0_37, %c128] : memref<64x256xbf16, #tpu.memory_space<vmem>>, vector<64x64xbf16>
    %cst_38 = arith.constant dense<0.000000e+00> : vector<32x64xf32>
    %103 = tpu.matmul %101, %102, %cst_38 {dimension_numbers = #tpu.dot_dimension_numbers<[1], [0], [0], [1], [0, 0, 1, 1], [], []>} : vector<32x64xbf16>, vector<64x64xbf16>, vector<32x64xf32> -> vector<32x64xf32>
    %c2 = arith.constant 2 : index
    %c0_39 = arith.constant 0 : index
    %104 = vector.load %arg4[%c2, %c0_39] : memref<8x128xf32, #tpu.memory_space<vmem>>, vector<1x64xf32>
    %105 = vector.broadcast %104 : vector<1x64xf32> to vector<32x64xf32>
    %106 = arith.addf %103, %105 : vector<32x64xf32>
    %cst_40 = arith.constant dense<0.000000e+00> : vector<64xf32>
    %107 = vector.multi_reduction <add>, %106, %cst_40 [0] : vector<32x64xf32> to vector<64xf32>
    %108 = vector.shape_cast %107 : vector<64xf32> to vector<1x64xf32>
    %cst_41 = arith.constant 3.200000e+01 : f32
    %109 = vector.broadcast %cst_41 : f32 to vector<1x64xf32>
    %110 = arith.divf %108, %109 : vector<1x64xf32>
    %111 = arith.mulf %106, %106 : vector<32x64xf32>
    %cst_42 = arith.constant dense<0.000000e+00> : vector<64xf32>
    %112 = vector.multi_reduction <add>, %111, %cst_42 [0] : vector<32x64xf32> to vector<64xf32>
    %113 = vector.shape_cast %112 : vector<64xf32> to vector<1x64xf32>
    %cst_43 = arith.constant 3.200000e+01 : f32
    %114 = vector.broadcast %cst_43 : f32 to vector<1x64xf32>
    %115 = arith.divf %113, %114 : vector<1x64xf32>
    %116 = arith.mulf %110, %110 : vector<1x64xf32>
    %117 = arith.subf %115, %116 : vector<1x64xf32>
    %c2_44 = arith.constant 2 : index
    %c64_45 = arith.constant 64 : index
    %118 = vector.load %arg4[%c2_44, %c64_45] : memref<8x128xf32, #tpu.memory_space<vmem>>, vector<1x64xf32>
    %cst_46 = arith.constant 9.99999974E-6 : f32
    %119 = vector.broadcast %cst_46 : f32 to vector<1x64xf32>
    %120 = arith.addf %117, %119 : vector<1x64xf32>
    %121 = math.rsqrt %120 : vector<1x64xf32>
    %122 = arith.mulf %118, %121 : vector<1x64xf32>
    %123 = vector.broadcast %110 : vector<1x64xf32> to vector<32x64xf32>
    %124 = arith.subf %106, %123 : vector<32x64xf32>
    %125 = vector.broadcast %122 : vector<1x64xf32> to vector<32x64xf32>
    %126 = arith.mulf %124, %125 : vector<32x64xf32>
    %c6 = arith.constant 6 : index
    %c0_47 = arith.constant 0 : index
    %127 = vector.load %arg4[%c6, %c0_47] : memref<8x128xf32, #tpu.memory_space<vmem>>, vector<1x64xf32>
    %128 = vector.broadcast %127 : vector<1x64xf32> to vector<32x64xf32>
    %129 = arith.addf %126, %128 : vector<32x64xf32>
    %cst_48 = arith.constant 0.000000e+00 : f32
    %130 = vector.broadcast %cst_48 : f32 to vector<32x64xf32>
    %131 = arith.cmpf oge, %129, %130 : vector<32x64xf32>
    %cst_49 = arith.constant 2.000000e-01 : f32
    %132 = vector.broadcast %cst_49 : f32 to vector<32x64xf32>
    %133 = arith.mulf %132, %129 : vector<32x64xf32>
    %134 = arith.select %131, %129, %133 : vector<32x64xi1>, vector<32x64xf32>
    %135 = arith.addf %134, %24 : vector<32x64xf32>
    %136 = arith.truncf %135 : vector<32x64xf32> to vector<32x64xbf16>
    %c0_50 = arith.constant 0 : index
    %c192 = arith.constant 192 : index
    %137 = vector.load %arg3[%c0_50, %c192] : memref<64x256xbf16, #tpu.memory_space<vmem>>, vector<64x64xbf16>
    %cst_51 = arith.constant dense<0.000000e+00> : vector<32x64xf32>
    %138 = tpu.matmul %136, %137, %cst_51 {dimension_numbers = #tpu.dot_dimension_numbers<[1], [0], [0], [1], [0, 0, 1, 1], [], []>} : vector<32x64xbf16>, vector<64x64xbf16>, vector<32x64xf32> -> vector<32x64xf32>
    %c3 = arith.constant 3 : index
    %c0_52 = arith.constant 0 : index
    %139 = vector.load %arg4[%c3, %c0_52] : memref<8x128xf32, #tpu.memory_space<vmem>>, vector<1x64xf32>
    %140 = vector.broadcast %139 : vector<1x64xf32> to vector<32x64xf32>
    %141 = arith.addf %138, %140 : vector<32x64xf32>
    %cst_53 = arith.constant 0.000000e+00 : f32
    %142 = vector.broadcast %cst_53 : f32 to vector<32x64xf32>
    %143 = arith.cmpf oge, %141, %142 : vector<32x64xf32>
    %cst_54 = arith.constant 2.000000e-01 : f32
    %144 = vector.broadcast %cst_54 : f32 to vector<32x64xf32>
    %145 = arith.mulf %144, %141 : vector<32x64xf32>
    %146 = arith.select %143, %141, %145 : vector<32x64xi1>, vector<32x64xf32>
    %c3_55 = arith.constant 3 : index
    %c64_56 = arith.constant 64 : index
    %147 = vector.load %arg4[%c3_55, %c64_56] : memref<8x128xf32, #tpu.memory_space<vmem>>, vector<1x64xf32>
    %148 = vector.broadcast %147 : vector<1x64xf32> to vector<32x64xf32>
    %149 = arith.mulf %146, %148 : vector<32x64xf32>
    %cst_57 = arith.constant dense<0.000000e+00> : vector<32xf32>
    %150 = vector.multi_reduction <add>, %149, %cst_57 [1] : vector<32x64xf32> to vector<32xf32>
    %151 = vector.shape_cast %150 : vector<32xf32> to vector<32x1xf32>
    %c0_58 = arith.constant 0 : index
    %c0_59 = arith.constant 0 : index
    %152 = vector.load %arg5[%c0_58, %c0_59] : memref<32x1xf32, #tpu.memory_space<vmem>>, vector<32x1xf32>
    tpu.vector_store %arg5[%c0_58, %c0_59], %151 {strides = array<i32>} : memref<32x1xf32, #tpu.memory_space<vmem>>, vector<32x1xf32>,
    return
  }
}

</mosaic_0001>

<bundles_post_ra>
// kernel: discriminator_forward.1
= control target key start
LH: loop header
LB: loop body
LE: loop exit
PB: predicated region body
PF: predicated region fallthrough
CT: control target
= control target key end

     0   :  { %v29_v0 = vlaneseq  ;;  %v1122_v6 = vmov 0.0   ;;  %vm42_vm1 = vcmask 195584   ;;  %vm154_vm2 = vcmask 1043456   ;;  %s1124_s26 = smov 64   ;;  %s1511_s0 = inlined_call_operand.vmem [shape: f32[64,24], index: 0, kind: input, shape index: {}]   ;;  %s1512_s1 = inlined_call_operand.vmem [shape: bf16[24,320], index: 1, kind: input, shape index: {}]   ;;  %s1513_s2 = inlined_call_operand.vmem [shape: f32[1,320], index: 2, kind: input, shape index: {}]   ;;  %s1514_s3 = inlined_call_operand.vmem [shape: bf16[64,256], index: 3, kind: input, shape index: {}]   ;;  %s1515_s4 = inlined_call_operand.vmem [shape: f32[8,128], index: 4, kind: input, shape index: {}]   ;;  %s1516_s5 = inlined_call_operand.vmem [shape: f32[32,1], index: 5, kind: output, shape index: {}]  }
   0x1   :  { %v1158_v1 = vld [vmem:[%s1511_s0 + $0x10] sm:$0xff]  ;;  %v1164_v3 = vld [vmem:[%s1511_s0] sm:$0xff]  ;;  %v1169_v4 = vld [vmem:[%s1511_s0 + $0x18] sm:$0xff]  ;;  %v1123_v34 = vmov 0   ;;  %vm365_vm7 = vcmask 523264  }
   0x2   :  { %v30_v2 = vand.u32 127, %v29_v0  ;;  %v1174_v5 = vld [vmem:[%s1511_s0 + $0x8] sm:$0xff]  ;;  %v1194_v13 = vld [vmem:[%s1511_s0 + $0x20] sm:$0xff]  ;;  %v1207_v20 = vld [vmem:[%s1511_s0 + $0x38] sm:$0xff]  ;;  %196 = vmatprep.mubr.bf16.mxu0 %v1123_v34  ;;  %222 = vmatprep.mubr.bf16.mxu1 %v1123_v34 }
   0x3   :  { %v1189_v12 = vld [vmem:[%s1511_s0 + $0x28] sm:$0xff]  ;;  %v1212_v21 = vld [vmem:[%s1511_s0 + $0x30] sm:$0xff]  ;;  %v99_v30 = vld [vmem:[%s1512_s1 + $0x18] sm:$0xff] }
   0x4   :  { %vm31_vm0 = vcmp.lt.s32.totalorder %v30_v2, 12  ;;  %v1101_v28 = vld [vmem:[%s1512_s1 + $0x4] ss:$12 sps:$4 sm:$0xff]   ;;  %v1103_v29 = vld [vmem:[%s1512_s1] ss:$12 sps:$4 sm:$0xff]   ;;  %v972_v31 = vcombine.high %v99_v30, %v99_v30  ;;  %v971_v32 = vcombine.low %v99_v30, %v99_v30 }
   0x5   :  { %v1176_v7 = vsel %vm31_vm0, 1.0, %v1122_v6  ;;  %164 = vmatprep.subr.bf16.mxu0 %v1101_v28  ;;  %1093 = vmatprep.subr.bf16.mxu1 %v1101_v28  ;;  %v1106_v35 = vld [vmem:[%s1512_s1 + $0x8] ss:$12 sps:$4 sm:$0xff]  }
   0x6   :  { %v36_v8 = vmul.f32 %v1176_v7, %v1158_v1  ;;  %v34_v9 = vmul.f32 %v1176_v7, %v1164_v3  ;;  %v37_v10 = vmul.f32 %v1176_v7, %v1169_v4  ;;  %v35_v11 = vmul.f32 %v1176_v7, %v1174_v5  ;;  %165 = vmatpush1.bf16.msra.mxu0 %v1103_v29 }
   0x7   :  { %v39_v18 = vmul.f32 %v1176_v7, %v1189_v12  ;;  %v38_v19 = vmul.f32 %v1176_v7, %v1194_v13  ;;  %v41_v24 = vmul.f32 %v1176_v7, %v1207_v20  ;;  %v40_v25 = vmul.f32 %v1176_v7, %v1212_v21  ;;  %1095 = vmatpush1.bf16.msra.mxu1 %v1103_v29 }
   0x8   :  { %v49_v14 = vsel %vm42_vm1, %v36_v8, 0.0  ;;  %v43_v15 = vsel %vm42_vm1, %v34_v9, 0.0  ;;  %v52_v16 = vsel %vm42_vm1, %v37_v10, 0.0  ;;  %v46_v17 = vsel %vm42_vm1, %v35_v11, 0.0  ;;  %974 = vmatprep.subr.msk.bf16.mxu0 %vm154_vm2, %v972_v31  ;;  %1094 = vmatprep.subr.msk.bf16.mxu1 %vm154_vm2, %v972_v31  ;;  %v1111_v31 = vld [vmem:[%s1514_s3 + $0x30] ss:$8 sps:$4 sm:$0xff]  }
   0x9   :  { %50 = vadd.xlane.f32.xlu1 %v49_v14  ;;  %44 = vadd.xlane.f32.xlu0 %v43_v15  ;;  %v58_v22 = vsel %vm42_vm1, %v39_v18, 0.0  ;;  %v55_v23 = vsel %vm42_vm1, %v38_v19, 0.0  ;;  %v64_v26 = vsel %vm42_vm1, %v41_v24, 0.0  ;;  %v61_v27 = vsel %vm42_vm1, %v40_v25, 0.0  ;;  %v1108_v15 = vld [vmem:[%s1514_s3] ss:$8 sps:$4 sm:$0xff]  }
   0xa   :  { %v156_v33 = vsel %vm154_vm2, %v971_v32, 0  ;;  %v1267_v11 = vshrl.u32 %v29_v0, 7  ;;  %v1109_v0 = vld [vmem:[%s1514_s3 + $0x10] ss:$8 sps:$4 sm:$0xff]  }
   0xb   :  { %167 = vmatpush1.bf16.msra.mxu0 %v156_v33  ;;  %1096 = vmatpush1.bf16.msra.mxu1 %v156_v33 }
   0xc   :  { %1033 = vmatprep.subr.bf16.mxu1 %v1106_v35 }
   0xd   :  { %53 = vadd.xlane.f32.xlu1 %v52_v16  ;;  %47 = vadd.xlane.f32.xlu0 %v46_v17 }
  0x11   :  { %59 = vadd.xlane.f32.xlu1 %v58_v22  ;;  %56 = vadd.xlane.f32.xlu0 %v55_v23  ;;  %v1288_v22 = vld [vmem:[%s1514_s3 + $0x20] ss:$8 sps:$4 sm:$0xff]  }
  0x15   :  { %65 = vadd.xlane.f32.xlu1 %v64_v26  ;;  %62 = vadd.xlane.f32.xlu0 %v61_v27 }
  0x96   :  { %v51_v36 = vpop.xlane.xlu1 %50  ;;  %v45_v37 = vpop.xlane.xlu0 %44 }
  0x97   :  { %v67_v38 = vmul.f32 0.083333336, %v45_v37  ;;  %v69_v43 = vmul.f32 0.083333336, %v51_v36 }
  0x99   :  { %v75_v41 = vmul.f32 %v1176_v7, %v67_v38  ;;  %v77_v50 = vmul.f32 %v1176_v7, %v69_v43 }
  0x9a   :  { %v54_v39 = vpop.xlane.xlu1 %53  ;;  %v48_v40 = vpop.xlane.xlu0 %47 }
  0x9b   :  { %v68_v42 = vmul.f32 0.083333336, %v48_v40  ;;  %v70_v44 = vmul.f32 0.083333336, %v54_v39  ;;  %v83_v48 = vsub.f32 %v1164_v3, %v75_v41  ;;  %v85_v57 = vsub.f32 %v1158_v1, %v77_v50  ;;  %v1107_v1 = vld [vmem:[%s1512_s1 + $0x20] ss:$0 sps:$4 sm:$0xff]  }
  0x9d   :  { %v76_v45 = vmul.f32 %v1176_v7, %v68_v42  ;;  %v78_v51 = vmul.f32 %v1176_v7, %v70_v44 }
  0x9e   :  { %v60_v46 = vpop.xlane.xlu1 %59  ;;  %v57_v47 = vpop.xlane.xlu0 %56 }
  0x9f   :  { %v84_v49 = vsub.f32 %v1174_v5, %v76_v45  ;;  %v86_v58 = vsub.f32 %v1169_v4, %v78_v51  ;;  %v72_v59 = vmul.f32 0.083333336, %v60_v46  ;;  %v71_v60 = vmul.f32 0.083333336, %v57_v47 }
  0xa1   :  { %v91_v52 = vpack.c.bf16 %v84_v49, %v83_v48  ;;  %v92_v3 = vpack.c.bf16 %v86_v58, %v85_v57  ;;  %v80_v5 = vmul.f32 %v1176_v7, %v72_v59  ;;  %v79_v6 = vmul.f32 %v1176_v7, %v71_v60 }
  0xa2   :  { %v66_v53 = vpop.xlane.xlu1 %65  ;;  %v63_v54 = vpop.xlane.xlu0 %62 }
  0xa3   :  { %v74_v55 = vmul.f32 0.083333336, %v66_v53  ;;  %v73_v56 = vmul.f32 0.083333336, %v63_v54  ;;  %975 = vmatmul.mubr.msk.bf16.vlgmr.msra.gmra.mrb[0].mxu0 %vm42_vm1, %v91_v52  ;;  %v88_v4 = vsub.f32 %v1189_v12, %v80_v5  ;;  %v87_v9 = vsub.f32 %v1194_v13, %v79_v6  ;;  %v1275_v13 = vld [vmem:[%s1513_s2] sm:$0x7] }
  0xa4   :  { %204 = vmatprep.mubr.bf16.mxu0 %v1123_v34  ;;  %v1270_v12 = vsub.s32 0, %v1267_v11 }
  0xa5   :  { %v82_v61 = vmul.f32 %v1176_v7, %v74_v55  ;;  %v81_v62 = vmul.f32 %v1176_v7, %v73_v56  ;;  %v162_v7 = vsel %vm154_vm2, %v1107_v1, 0  ;;  %v93_v10 = vpack.c.bf16 %v88_v4, %v87_v9 }
  0xa6   :  { %v106_v14 = vrot.slane %v1275_v13, %v1270_v12 }
  0xa7   :  { %v90_v63 = vsub.f32 %v1207_v20, %v82_v61  ;;  %v89_v2 = vsub.f32 %v1212_v21, %v81_v62 }
  0xa9   :  { %v94_v8 = vpack.c.bf16 %v90_v63, %v89_v2 }
  0xab   :  { %976 = vmatmul.mubr.msk.bf16.gmra.mrb[4].mxu0 %vm42_vm1, %v92_v3  ;;  %978 = vmatmul.mubr.msk.bf16.vlgmr.msra.gmra.mrb[0].mxu1 %vm42_vm1, %v94_v8 }
  0xac   :  { %1034 = vmatpush3.bf16.msra.mxu1 %v1106_v35  ;;  %1037 = vmatprep.mubr.msk.bf16.mxu1 %vm42_vm1, %v91_v52 }
  0xad   :  { %1097 = vmatprep.subr.msk.bf16.mxu1 %vm154_vm2, %v1107_v1  ;;  %212 = vmatprep.mubr.bf16.mxu0 %v1123_v34 }
  0xb0   :  { %1036 = vmatpush3.bf16.msra.mxu1 %v162_v7 }
  0xb1   :  { %1045 = vmatprep.subr.bf16.mxu1 %v1108_v15 }
  0xb3   :  { %977 = vmatmul.mubr.msk.bf16.gmra.mrb[8].mxu0 %vm42_vm1, %v93_v10  ;;  %1038 = vmatmul.mubr.msk.bf16.vlgmr.msra.gmra.mrb[4].mxu1 %vm42_vm1, %v92_v3 }
  0xb4   :  { %1041 = vmatprep.mubr.msk.bf16.mxu1 %vm42_vm1, %v93_v10  ;;  %1046 = vmatpush3.bf16.msra.mxu1 %v1108_v15 }
  0xb5   :  { %1047 = vmatprep.subr.bf16.mxu1 %v1109_v0 }
  0xb8   :  { %1048 = vmatpush3.bf16.msra.mxu1 %v1109_v0 }
  0xb9   :  { %1049 = vmatprep.subr.bf16.mxu1 %v1288_v22 }
  0xbb   :  { %1042 = vmatmul.mubr.msk.bf16.gmra.mrb[8].mxu1 %vm42_vm1, %v94_v8  ;;  %v336_v8 = vld [vmem:[%s1515_s4] sm:$0x1] }
  0xbc   :  { %1050 = vmatpush3.bf16.msra.mxu1 %v1288_v22  ;;  %v340_v1 = vrot.slane %v336_v8, %v1270_v12 }
  0xbd   :  { %1051 = vmatprep.subr.bf16.mxu1 %v1111_v31 }
  0xc0   :  { %1052 = vmatpush3.bf16.msra.mxu1 %v1111_v31 }
 0x176   :  { %v198_v16 = vpop.f32.mrb[0].mxu0 }
 0x177   :  { %v199_v17 = vadd.f32 %v198_v16, %v106_v14  ;;  %v200_v18 = vpop.f32.mrb[1].mxu0 }
 0x178   :  { %v201_v19 = vpop.f32.mrb[2].mxu0 }
 0x179   :  { %v202_v20 = vadd.f32 %v201_v19, %v106_v14  ;;  %v203_v21 = vpop.f32.mrb[3].mxu0  ;;  %v298_v50 = vmul.f32 0.2, %v199_v17  ;;  %vm294_vm3 = vcmp.ge.f32.partialorder %v199_v17, 0.0 }
 0x17b   :  { %v299_v51 = vmul.f32 0.2, %v202_v20  ;;  %vm295_vm4 = vcmp.ge.f32.partialorder %v202_v20, 0.0  ;;  %v302_v56 = vsel %vm294_vm3, %v199_v17, %v298_v50 }
 0x17d   :  { %v303_v57 = vsel %vm295_vm4, %v202_v20, %v299_v51 }
 0x17e   :  { %v206_v23 = vpop.f32.mrb[4].mxu0  ;;  %v224_v24 = vpop.f32.mrb[0].mxu1 }
 0x17f   :  { %v207_v25 = vadd.f32 %v206_v23, %v106_v14  ;;  %v225_v26 = vadd.f32 %v224_v24, %v106_v14  ;;  %v208_v27 = vpop.f32.mrb[5].mxu0  ;;  %v1291_v28 = vpop.f32.mrb[1].mxu1 }
 0x180   :  { %v209_v29 = vpop.f32.mrb[6].mxu0  ;;  %v228_v30 = vpop.f32.mrb[2].mxu1 }
 0x181   :  { %v210_v32 = vadd.f32 %v209_v29, %v106_v14  ;;  %v211_v33 = vpop.f32.mrb[7].mxu0  ;;  %314 = vrot.lane.b32.xlu1 %v225_v26, %s1124_s26  ;;  %v1298_v34 = vpop.f32.mrb[3].mxu1  ;;  %v229_v45 = vadd.f32 %v228_v30, %v106_v14  ;;  %v300_v54 = vmul.f32 0.2, %v207_v25  ;;  %vm296_vm5 = vcmp.ge.f32.partialorder %v207_v25, 0.0 }
 0x183   :  { %v301_v55 = vmul.f32 0.2, %v210_v32  ;;  %vm297_vm6 = vcmp.ge.f32.partialorder %v210_v32, 0.0  ;;  %v304_v62 = vsel %vm296_vm5, %v207_v25, %v300_v54 }
 0x185   :  { %v305_v63 = vsel %vm297_vm6, %v210_v32, %v301_v55 }
 0x186   :  { %v214_v35 = vpop.f32.mrb[8].mxu0  ;;  %v1039_v36 = vpop.f32.mrb[4].mxu1 }
 0x187   :  { %v215_v37 = vadd.f32 %v214_v35, %v106_v14  ;;  %v1300_v38 = vpop.f32.mrb[9].mxu0  ;;  %v267_v39 = vpop.f32.mrb[5].mxu1 }
 0x188   :  { %v218_v40 = vpop.f32.mrb[10].mxu0  ;;  %v1040_v41 = vpop.f32.mrb[6].mxu1 }
 0x189   :  { %v219_v42 = vadd.f32 %v218_v40, %v106_v14  ;;  %v1302_v43 = vpop.f32.mrb[11].mxu0  ;;  %310 = vrot.lane.b32.xlu0 %v215_v37, %s1124_s26  ;;  %v269_v44 = vpop.f32.mrb[7].mxu1 }
 0x18b   :  { %312 = vrot.lane.b32.xlu1 %v219_v42, %s1124_s26 }
 0x18e   :  { %v1306_v46 = vpop.f32.mrb[8].mxu1 }
 0x18f   :  { %v1308_v47 = vpop.f32.mrb[9].mxu1  ;;  %316 = vrot.lane.b32.xlu1 %v229_v45, %s1124_s26 }
 0x190   :  { %v1311_v48 = vpop.f32.mrb[10].mxu1 }
 0x191   :  { %v1313_v49 = vpop.f32.mrb[11].mxu1 }
 0x193   :  { %511 = vrot.lane.b32.xlu1 %v1108_v15, %s1124_s26 }
 0x197   :  { %513 = vrot.lane.b32.xlu1 %v1109_v0, %s1124_s26 }
 0x19b   :  { %517 = vrot.lane.b32.xlu1 %v1111_v31, %s1124_s26 }
 0x1f3   :  { %v315_v52 = vpop.permute.xlu1 %314 }
 0x1f4   :  { %v324_v3 = vadd.f32 %v315_v52, %v304_v62 }
 0x1fb   :  { %v311_v53 = vpop.permute.xlu0 %310 }
 0x1fc   :  { %v322_v59 = vadd.f32 %v311_v53, %v302_v56 }
 0x1fd   :  { %v313_v58 = vpop.permute.xlu1 %312 }
 0x1fe   :  { %v323_v60 = vadd.f32 %v313_v58, %v303_v57 }
 0x200   :  { %v326_v61 = vpack.c.bf16 %v323_v60, %v322_v59 }
 0x201   :  { %v317_v2 = vpop.permute.xlu1 %316 }
 0x202   :  { %v325_v5 = vadd.f32 %v317_v2, %v305_v63  ;;  %1053 = vmatprep.mubr.msk.bf16.mxu1 %vm365_vm7, %v326_v61 }
 0x204   :  { %v327_v6 = vpack.c.bf16 %v325_v5, %v324_v3 }
 0x205   :  { %v512_v3 = vpop.permute.xlu1 %511 }
 0x206   :  { %1054 = vmatmul.mubr.msk.bf16.vlgmr.msra.gmra.mrb[12].mxu1 %vm365_vm7, %v327_v6  ;;  %1057 = vmatprep.subr.bf16.mxu0 %v512_v3 }
 0x207   :  { %1058 = vmatpush3.bf16.msra.mxu0 %v512_v3 }
 0x209   :  { %v514_v6 = vpop.permute.xlu1 %513 }
 0x20a   :  { %1059 = vmatprep.subr.bf16.mxu0 %v514_v6 }
 0x20b   :  { %1060 = vmatpush3.bf16.msra.mxu0 %v514_v6 }
 0x2d9   :  { %v1055_v4 = vpop.f32.mrb[12].mxu1 }
 0x2da   :  { %v406_v9 = vpop.f32.mrb[13].mxu1  ;;  %v1324_v7 = vadd.f32 %v1055_v4, %v340_v1 }
 0x2db   :  { %v407_v10 = vadd.f32 %v406_v9, %v340_v1  ;;  %v1056_v14 = vpop.f32.mrb[14].mxu1 }
 0x2dc   :  { %v409_v15 = vpop.f32.mrb[15].mxu1  ;;  %v418_v16 = vadd.f32 %v1056_v14, %v340_v1  ;;  %v438_v18 = vmul.f32 %v1324_v7, %v1324_v7  ;;  %v424_v24 = vsel %vm365_vm7, %v1324_v7, 0.0 }
 0x2dd   :  { %v436_v0 = vmul.f32 %v407_v10, %v407_v10  ;;  %v410_v17 = vadd.f32 %v409_v15, %v340_v1  ;;  %v421_v19 = vsel %vm365_vm7, %v407_v10, 0.0 }
 0x2de   :  { %v439_v26 = vmul.f32 %v418_v16, %v418_v16  ;;  %v443_v31 = vsel %vm365_vm7, %v438_v18, 0.0  ;;  %v426_v32 = vsel %vm365_vm7, %v418_v16, 0.0 }
 0x2df   :  { %v422_v20 = vsel %vm365_vm7, %v410_v17, 0.0  ;;  %v437_v21 = vmul.f32 %v410_v17, %v410_v17  ;;  %v440_v25 = vsel %vm365_vm7, %v436_v0, 0.0 }
 0x2e0   :  { %v423_v23 = vadd.f32 %v422_v20, %v421_v19  ;;  %v445_v36 = vsel %vm365_vm7, %v439_v26, 0.0 }
 0x2e1   :  { %v441_v27 = vsel %vm365_vm7, %v437_v21, 0.0 }
 0x2e2   :  { %v425_v29 = vadd.f32 %v424_v24, %v423_v23  ;;  %v442_v30 = vadd.f32 %v441_v27, %v440_v25  ;;  %v518_v24 = vpop.permute.xlu1 %517 }
 0x2e4   :  { %v427_v33 = vadd.f32 %v426_v32, %v425_v29  ;;  %v444_v35 = vadd.f32 %v443_v31, %v442_v30 }
 0x2e6   :  { %v428_v37 = vrot.slane %v427_v33, 4  ;;  %v446_v39 = vadd.f32 %v445_v36, %v444_v35 }
 0x2e8   :  { %v429_v40 = vadd.f32 %v428_v37, %v427_v33  ;;  %v447_v41 = vrot.slane %v446_v39, 4 }
 0x2ea   :  { %v430_v42 = vrot.slane %v429_v40, 2  ;;  %v448_v44 = vadd.f32 %v447_v41, %v446_v39 }
 0x2ec   :  { %v431_v45 = vadd.f32 %v430_v42, %v429_v40  ;;  %v449_v50 = vrot.slane %v448_v44, 2 }
 0x2ee   :  { %v432_v51 = vrot.slane %v431_v45, 1  ;;  %v450_v52 = vadd.f32 %v449_v50, %v448_v44 }
 0x2f0   :  { %v433_v53 = vadd.f32 %v432_v51, %v431_v45  ;;  %v451_v54 = vrot.slane %v450_v52, 1 }
 0x2f2   :  { %v435_v55 = vmul.f32 0.03125, %v433_v53  ;;  %v452_v56 = vadd.f32 %v451_v54, %v450_v52 }
 0x2f4   :  { %v453_v57 = vmul.f32 0.03125, %v452_v56  ;;  %v454_v58 = vmul.f32 %v435_v55, %v435_v55  ;;  %v464_v59 = vsub.f32 %v410_v17, %v435_v55  ;;  %v463_v60 = vsub.f32 %v407_v10, %v435_v55  ;;  %v989_v10 = vld [vmem:[%s1515_s4 + $0x4] ss:$0 sm:$0xff] }
 0x2f5   :  { %v465_v61 = vsub.f32 %v1324_v7, %v435_v55  ;;  %v466_v62 = vsub.f32 %v418_v16, %v435_v55  ;;  %v109_v7 = vsub.s32 1, %v1267_v11 }
 0x2f6   :  { %v455_v63 = vsub.f32 %v453_v57, %v454_v58 }
 0x2f8   :  { %v456_v2 = vadd.f32 1e-05, %v455_v63 }
 0x2fa   :  { %1116 = vrsqrt.f32 %v456_v2 }
 0x304   :  { %v1117_v5 = vpop.eup %1116 }
 0x305   :  { %459 = vrot.lane.b32.xlu0 %v1117_v5, %s1124_s26 }
 0x377   :  { %v460_v1 = vpop.permute.xlu0 %459 }
 0x378   :  { %v462_v4 = vmul.f32 %v460_v1, %v336_v8  ;;  %v110_v8 = vrot.slane %v1275_v13, %v109_v7 }
 0x37a   :  { %v470_v9 = vrot.slane %v462_v4, %v1270_v12  ;;  %v1349_v27 = vadd.f32 %v1291_v28, %v110_v8  ;;  %v1352_v29 = vadd.f32 %v1300_v38, %v110_v8  ;;  %v1355_v30 = vadd.f32 %v1302_v43, %v110_v8 }
 0x37b   :  { %v1358_v32 = vadd.f32 %v1298_v34, %v110_v8  ;;  %v1371_v34 = vld [vmem:[%s1515_s4 + $0x1] sm:$0x1] }
 0x37c   :  { %472 = vrot.lane.b32.xlu0 %v470_v9, %s1124_s26  ;;  %v510_v42 = vrot.slane %v1371_v34, %v1270_v12 }
 0x380   :  { %515 = vrot.lane.b32.xlu0 %v1288_v22, %s1124_s26 }
 0x3ee   :  { %v473_v14 = vpop.permute.xlu0 %472 }
 0x3ef   :  { %v475_v15 = vmul.f32 %v473_v14, %v463_v60  ;;  %v476_v0 = vmul.f32 %v473_v14, %v464_v59  ;;  %v477_v16 = vmul.f32 %v473_v14, %v465_v61  ;;  %v478_v17 = vmul.f32 %v473_v14, %v466_v62 }
 0x3f1   :  { %v484_v18 = vadd.f32 %v989_v10, %v475_v15  ;;  %v485_v19 = vadd.f32 %v989_v10, %v476_v0  ;;  %v486_v20 = vadd.f32 %v989_v10, %v477_v16  ;;  %v487_v21 = vadd.f32 %v989_v10, %v478_v17 }
 0x3f2   :  { %v516_v23 = vpop.permute.xlu0 %515 }
 0x3f3   :  { %vm488_vm8 = vcmp.ge.f32.partialorder %v484_v18, 0.0  ;;  %vm489_vm9 = vcmp.ge.f32.partialorder %v485_v19, 0.0  ;;  %vm490_vm10 = vcmp.ge.f32.partialorder %v486_v20, 0.0  ;;  %vm491_vm11 = vcmp.ge.f32.partialorder %v487_v21, 0.0  ;;  %1061 = vmatprep.subr.bf16.mxu0 %v516_v23 }
 0x3f4   :  { %v492_v22 = vmul.f32 0.2, %v484_v18  ;;  %v493_v25 = vmul.f32 0.2, %v485_v19  ;;  %v494_v26 = vmul.f32 0.2, %v486_v20  ;;  %1062 = vmatpush3.bf16.msra.mxu0 %v516_v23 }
 0x3f5   :  { %v495_v31 = vmul.f32 0.2, %v487_v21  ;;  %1063 = vmatprep.subr.bf16.mxu0 %v518_v24 }
 0x3f6   :  { %v498_v33 = vsel %vm490_vm10, %v486_v20, %v494_v26  ;;  %v496_v35 = vsel %vm488_vm8, %v484_v18, %v492_v22  ;;  %v497_v36 = vsel %vm489_vm9, %v485_v19, %v493_v25  ;;  %vm958_vm9 = vcmask 7168  }
 0x3f7   :  { %v499_v37 = vsel %vm491_vm11, %v487_v21, %v495_v31  ;;  %v502_v28 = vadd.f32 %v498_v33, %v1349_v27  ;;  %v500_v39 = vadd.f32 %v496_v35, %v1352_v29  ;;  %v501_v38 = vadd.f32 %v497_v36, %v1355_v30 }
 0x3f8   :  { %v503_v43 = vadd.f32 %v499_v37, %v1358_v32  ;;  %1064 = vmatpush3.bf16.msra.mxu0 %v518_v24 }
 0x3f9   :  { %v504_v40 = vpack.c.bf16 %v501_v38, %v500_v39 }
 0x3fa   :  { %v505_v41 = vpack.c.bf16 %v503_v43, %v502_v28  ;;  %v1112_v43 = vld [vmem:[%s1514_s3 + $0x4] ss:$8 sps:$4 sm:$0xff]  }
 0x3fb   :  { %1065 = vmatprep.mubr.msk.bf16.mxu0 %vm365_vm7, %v504_v40  ;;  %1069 = vmatprep.subr.bf16.mxu1 %v1112_v43  ;;  %v1113_v40 = vld [vmem:[%s1514_s3 + $0x14] ss:$8 sps:$4 sm:$0xff]  }
 0x3fc   :  { %1066 = vmatmul.mubr.msk.bf16.vlgmr.msra.gmra.mrb[12].mxu0 %vm365_vm7, %v505_v41  ;;  %1070 = vmatpush3.bf16.msra.mxu1 %v1112_v43  ;;  %v1421_v41 = vld [vmem:[%s1514_s3 + $0x24] ss:$8 sps:$4 sm:$0xff]  }
 0x3fd   :  { %1071 = vmatprep.subr.bf16.mxu1 %v1113_v40 }
 0x400   :  { %1072 = vmatpush3.bf16.msra.mxu1 %v1113_v40 }
 0x401   :  { %1073 = vmatprep.subr.bf16.mxu1 %v1421_v41 }
 0x404   :  { %1074 = vmatpush3.bf16.msra.mxu1 %v1421_v41 }
 0x4cf   :  { %v1067_v44 = vpop.f32.mrb[12].mxu0 }
 0x4d0   :  { %v563_v45 = vpop.f32.mrb[13].mxu0  ;;  %v1375_v50 = vadd.f32 %v1067_v44, %v510_v42 }
 0x4d1   :  { %v1377_v51 = vadd.f32 %v563_v45, %v510_v42  ;;  %v1068_v52 = vpop.f32.mrb[14].mxu0 }
 0x4d2   :  { %v566_v53 = vpop.f32.mrb[15].mxu0  ;;  %v1381_v55 = vadd.f32 %v1068_v52, %v510_v42  ;;  %v594_v57 = vmul.f32 %v1375_v50, %v1375_v50  ;;  %v581_v62 = vsel %vm365_vm7, %v1375_v50, 0.0 }
 0x4d3   :  { %v592_v54 = vmul.f32 %v1377_v51, %v1377_v51  ;;  %v1383_v56 = vadd.f32 %v566_v53, %v510_v42  ;;  %v578_v58 = vsel %vm365_vm7, %v1377_v51, 0.0 }
 0x4d4   :  { %v595_v2 = vmul.f32 %v1381_v55, %v1381_v55  ;;  %v599_v1 = vsel %vm365_vm7, %v594_v57, 0.0  ;;  %v583_v4 = vsel %vm365_vm7, %v1381_v55, 0.0 }
 0x4d5   :  { %v579_v59 = vsel %vm365_vm7, %v1383_v56, 0.0  ;;  %v593_v60 = vmul.f32 %v1383_v56, %v1383_v56  ;;  %v596_v63 = vsel %vm365_vm7, %v592_v54, 0.0 }
 0x4d6   :  { %v580_v61 = vadd.f32 %v579_v59, %v578_v58  ;;  %v601_v10 = vsel %vm365_vm7, %v595_v2, 0.0 }
 0x4d7   :  { %v597_v3 = vsel %vm365_vm7, %v593_v60, 0.0 }
 0x4d8   :  { %v582_v5 = vadd.f32 %v581_v62, %v580_v61  ;;  %v598_v6 = vadd.f32 %v597_v3, %v596_v63 }
 0x4da   :  { %v584_v9 = vadd.f32 %v583_v4, %v582_v5  ;;  %v600_v7 = vadd.f32 %v599_v1, %v598_v6 }
 0x4dc   :  { %v585_v14 = vrot.slane %v584_v9, 4  ;;  %v602_v15 = vadd.f32 %v601_v10, %v600_v7 }
 0x4de   :  { %v586_v0 = vadd.f32 %v585_v14, %v584_v9  ;;  %v603_v16 = vrot.slane %v602_v15, 4 }
 0x4e0   :  { %v587_v17 = vrot.slane %v586_v0, 2  ;;  %v604_v8 = vadd.f32 %v603_v16, %v602_v15  ;;  %v686_v15 = vld [vmem:[%s1515_s4 + $0x2] sm:$0x1] }
 0x4e2   :  { %v588_v18 = vadd.f32 %v587_v17, %v586_v0  ;;  %v605_v19 = vrot.slane %v604_v8, 2  ;;  %v690_v0 = vrot.slane %v686_v15, %v1270_v12 }
 0x4e4   :  { %v589_v20 = vrot.slane %v588_v18, 1  ;;  %v606_v21 = vadd.f32 %v605_v19, %v604_v8 }
 0x4e6   :  { %v590_v23 = vadd.f32 %v589_v20, %v588_v18  ;;  %v607_v24 = vrot.slane %v606_v21, 1 }
 0x4e8   :  { %v591_v22 = vmul.f32 0.03125, %v590_v23  ;;  %v608_v25 = vadd.f32 %v607_v24, %v606_v21 }
 0x4ea   :  { %v609_v26 = vmul.f32 0.03125, %v608_v25  ;;  %v610_v31 = vmul.f32 %v591_v22, %v591_v22  ;;  %v620_v33 = vsub.f32 %v1383_v56, %v591_v22  ;;  %v619_v35 = vsub.f32 %v1377_v51, %v591_v22 }
 0x4eb   :  { %v621_v36 = vsub.f32 %v1375_v50, %v591_v22  ;;  %v622_v37 = vsub.f32 %v1381_v55, %v591_v22 }
 0x4ec   :  { %v611_v28 = vsub.f32 %v609_v26, %v610_v31 }
 0x4ee   :  { %v612_v39 = vadd.f32 1e-05, %v611_v28 }
 0x4f0   :  { %1118 = vrsqrt.f32 %v612_v39 }
 0x4fa   :  { %v1119_v38 = vpop.eup %1118 }
 0x4fb   :  { %615 = vrot.lane.b32.xlu0 %v1119_v38, %s1124_s26 }
 0x4ff   :  { %660 = vrot.lane.b32.xlu0 %v1352_v29, %s1124_s26  ;;  %v1115_v29 = vld [vmem:[%s1514_s3 + $0x34] ss:$8 sps:$4 sm:$0xff]  }
 0x500   :  { %1075 = vmatprep.subr.bf16.mxu1 %v1115_v29 }
 0x501   :  { %1076 = vmatpush3.bf16.msra.mxu1 %v1115_v29 }
 0x503   :  { %664 = vrot.lane.b32.xlu0 %v1349_v27, %s1124_s26 }
 0x56d   :  { %v616_v27 = vpop.permute.xlu0 %615 }
 0x56e   :  { %v618_v42 = vmul.f32 %v616_v27, %v1371_v34  ;;  %v992_v34 = vld [vmem:[%s1515_s4 + $0x5] ss:$0 sm:$0xff] }
 0x570   :  { %v626_v44 = vrot.slane %v618_v42, %v1270_v12 }
 0x571   :  { %v661_v54 = vpop.permute.xlu0 %660 }
 0x572   :  { %628 = vrot.lane.b32.xlu1 %v626_v44, %s1124_s26 }
 0x575   :  { %v665_v2 = vpop.permute.xlu0 %664 }
 0x576   :  { %662 = vrot.lane.b32.xlu1 %v1355_v30, %s1124_s26 }
 0x57a   :  { %666 = vrot.lane.b32.xlu1 %v1358_v32, %s1124_s26 }
 0x57e   :  { %859 = vrot.lane.b32.xlu1 %v1112_v43, %s1124_s26 }
 0x582   :  { %861 = vrot.lane.b32.xlu1 %v1113_v40, %s1124_s26 }
 0x586   :  { %865 = vrot.lane.b32.xlu1 %v1115_v29, %s1124_s26 }
 0x5e4   :  { %v629_v45 = vpop.permute.xlu1 %628 }
 0x5e5   :  { %v631_v50 = vmul.f32 %v629_v45, %v619_v35  ;;  %v632_v51 = vmul.f32 %v629_v45, %v620_v33  ;;  %v633_v52 = vmul.f32 %v629_v45, %v621_v36  ;;  %v634_v53 = vmul.f32 %v629_v45, %v622_v37 }
 0x5e7   :  { %v640_v30 = vadd.f32 %v992_v34, %v631_v50  ;;  %v642_v55 = vadd.f32 %v992_v34, %v633_v52  ;;  %v641_v56 = vadd.f32 %v992_v34, %v632_v51  ;;  %v643_v32 = vadd.f32 %v992_v34, %v634_v53 }
 0x5e8   :  { %v663_v57 = vpop.permute.xlu1 %662 }
 0x5e9   :  { %vm644_vm12 = vcmp.ge.f32.partialorder %v640_v30, 0.0  ;;  %vm645_vm13 = vcmp.ge.f32.partialorder %v641_v56, 0.0  ;;  %v648_v58 = vmul.f32 0.2, %v640_v30  ;;  %v649_v59 = vmul.f32 0.2, %v641_v56 }
 0x5ea   :  { %vm646_vm14 = vcmp.ge.f32.partialorder %v642_v55, 0.0  ;;  %vm647_vm15 = vcmp.ge.f32.partialorder %v643_v32, 0.0  ;;  %v650_v60 = vmul.f32 0.2, %v642_v55  ;;  %v651_v61 = vmul.f32 0.2, %v643_v32 }
 0x5eb   :  { %v652_v62 = vsel %vm644_vm12, %v640_v30, %v648_v58  ;;  %v653_v63 = vsel %vm645_vm13, %v641_v56, %v649_v59 }
 0x5ec   :  { %v672_v3 = vadd.f32 %v661_v54, %v652_v62  ;;  %v673_v5 = vadd.f32 %v663_v57, %v653_v63  ;;  %v654_v6 = vsel %vm646_vm14, %v642_v55, %v650_v60  ;;  %v655_v1 = vsel %vm647_vm15, %v643_v32, %v651_v61  ;;  %v667_v4 = vpop.permute.xlu1 %666 }
 0x5ed   :  { %v674_v9 = vadd.f32 %v665_v2, %v654_v6  ;;  %v675_v7 = vadd.f32 %v667_v4, %v655_v1 }
 0x5ee   :  { %v676_v10 = vpack.c.bf16 %v673_v5, %v672_v3 }
 0x5ef   :  { %v677_v14 = vpack.c.bf16 %v675_v7, %v674_v9 }
 0x5f0   :  { %1077 = vmatprep.mubr.msk.bf16.mxu1 %vm365_vm7, %v676_v10  ;;  %v860_v6 = vpop.permute.xlu1 %859 }
 0x5f1   :  { %1078 = vmatmul.mubr.msk.bf16.vlgmr.msra.gmra.mrb[16].mxu1 %vm365_vm7, %v677_v14  ;;  %1081 = vmatprep.subr.bf16.mxu0 %v860_v6  ;;  %v1000_v14 = vld [vmem:[%s1515_s4 + $0x3] ss:$0 sm:$0xff] }
 0x5f2   :  { %1082 = vmatpush3.bf16.msra.mxu0 %v860_v6 }
 0x5f4   :  { %v862_v4 = vpop.permute.xlu1 %861 }
 0x5f5   :  { %1083 = vmatprep.subr.bf16.mxu0 %v862_v4 }
 0x5f6   :  { %1084 = vmatpush3.bf16.msra.mxu0 %v862_v4 }
 0x6c4   :  { %v1079_v16 = vpop.f32.mrb[16].mxu1 }
 0x6c5   :  { %v755_v17 = vpop.f32.mrb[17].mxu1  ;;  %v1447_v8 = vadd.f32 %v1079_v16, %v690_v0  ;;  %v999_v16 = vld [vmem:[%s1515_s4 + $0x6] ss:$0 sm:$0xff] }
 0x6c6   :  { %v1449_v18 = vadd.f32 %v755_v17, %v690_v0  ;;  %v1080_v19 = vpop.f32.mrb[18].mxu1 }
 0x6c7   :  { %v758_v20 = vpop.f32.mrb[19].mxu1  ;;  %v1453_v23 = vadd.f32 %v1080_v19, %v690_v0  ;;  %v786_v22 = vmul.f32 %v1447_v8, %v1447_v8  ;;  %v773_v35 = vsel %vm365_vm7, %v1447_v8, 0.0 }
 0x6c8   :  { %v784_v21 = vmul.f32 %v1449_v18, %v1449_v18  ;;  %v759_v24 = vadd.f32 %v758_v20, %v690_v0  ;;  %v770_v25 = vsel %vm365_vm7, %v1449_v18, 0.0  ;;  %v113_v0 = vsub.s32 2, %v1267_v11 }
 0x6c9   :  { %v787_v37 = vmul.f32 %v1453_v23, %v1453_v23  ;;  %v791_v43 = vsel %vm365_vm7, %v786_v22, 0.0  ;;  %v775_v40 = vsel %vm365_vm7, %v1453_v23, 0.0  ;;  %v866_v22 = vpop.permute.xlu1 %865 }
 0x6ca   :  { %v771_v26 = vsel %vm365_vm7, %v759_v24, 0.0  ;;  %v785_v31 = vmul.f32 %v759_v24, %v759_v24  ;;  %v788_v36 = vsel %vm365_vm7, %v784_v21, 0.0  ;;  %v114_v19 = vrot.slane %v1275_v13, %v113_v0 }
 0x6cb   :  { %v772_v33 = vadd.f32 %v771_v26, %v770_v25  ;;  %v793_v42 = vsel %vm365_vm7, %v787_v37, 0.0 }
 0x6cc   :  { %v789_v28 = vsel %vm365_vm7, %v785_v31, 0.0  ;;  %v288_v31 = vadd.f32 %v1306_v46, %v114_v19  ;;  %v283_v13 = vadd.f32 %v1313_v49, %v114_v19 }
 0x6cd   :  { %v774_v39 = vadd.f32 %v773_v35, %v772_v33  ;;  %v790_v38 = vadd.f32 %v789_v28, %v788_v36  ;;  %v280_v33 = vadd.f32 %v1308_v47, %v114_v19  ;;  %v291_v36 = vadd.f32 %v1311_v48, %v114_v19 }
 0x6cf   :  { %v776_v29 = vadd.f32 %v775_v40, %v774_v39  ;;  %v792_v27 = vadd.f32 %v791_v43, %v790_v38 }
 0x6d1   :  { %v777_v44 = vrot.slane %v776_v29, 4  ;;  %v794_v34 = vadd.f32 %v793_v42, %v792_v27 }
 0x6d3   :  { %v778_v45 = vadd.f32 %v777_v44, %v776_v29  ;;  %v795_v50 = vrot.slane %v794_v34, 4 }
 0x6d5   :  { %v779_v51 = vrot.slane %v778_v45, 2  ;;  %v796_v52 = vadd.f32 %v795_v50, %v794_v34 }
 0x6d7   :  { %v780_v53 = vadd.f32 %v779_v51, %v778_v45  ;;  %v797_v54 = vrot.slane %v796_v52, 2 }
 0x6d9   :  { %v781_v30 = vrot.slane %v780_v53, 1  ;;  %v798_v55 = vadd.f32 %v797_v54, %v796_v52 }
 0x6db   :  { %v782_v56 = vadd.f32 %v781_v30, %v780_v53  ;;  %v799_v32 = vrot.slane %v798_v55, 1 }
 0x6dd   :  { %v783_v57 = vmul.f32 0.03125, %v782_v56  ;;  %v800_v58 = vadd.f32 %v799_v32, %v798_v55 }
 0x6df   :  { %v801_v59 = vmul.f32 0.03125, %v800_v58  ;;  %v802_v60 = vmul.f32 %v783_v57, %v783_v57  ;;  %v812_v61 = vsub.f32 %v759_v24, %v783_v57  ;;  %v811_v62 = vsub.f32 %v1449_v18, %v783_v57 }
 0x6e0   :  { %v813_v63 = vsub.f32 %v1447_v8, %v783_v57  ;;  %v814_v2 = vsub.f32 %v1453_v23, %v783_v57 }
 0x6e1   :  { %v803_v3 = vsub.f32 %v801_v59, %v802_v60 }
 0x6e3   :  { %v804_v5 = vadd.f32 1e-05, %v803_v3 }
 0x6e5   :  { %1120 = vrsqrt.f32 %v804_v5 }
 0x6ef   :  { %v1121_v1 = vpop.eup %1120 }
 0x6f0   :  { %807 = vrot.lane.b32.xlu0 %v1121_v1, %s1124_s26 }
 0x762   :  { %v808_v9 = vpop.permute.xlu0 %807 }
 0x763   :  { %v810_v7 = vmul.f32 %v808_v9, %v686_v15 }
 0x765   :  { %v818_v10 = vrot.slane %v810_v7, %v1270_v12 }
 0x767   :  { %820 = vrot.lane.b32.xlu0 %v818_v10, %s1124_s26 }
 0x76b   :  { %863 = vrot.lane.b32.xlu0 %v1421_v41, %s1124_s26 }
 0x76f   :  { %939 = vrot.lane.b32.xlu0 %v1000_v14, %s1124_s26 }
 0x7d9   :  { %v821_v15 = vpop.permute.xlu0 %820 }
 0x7da   :  { %v823_v17 = vmul.f32 %v821_v15, %v811_v62  ;;  %v824_v12 = vmul.f32 %v821_v15, %v812_v61  ;;  %v825_v8 = vmul.f32 %v821_v15, %v813_v63  ;;  %v826_v18 = vmul.f32 %v821_v15, %v814_v2 }
 0x7dc   :  { %v832_v41 = vadd.f32 %v999_v16, %v823_v17  ;;  %v833_v20 = vadd.f32 %v999_v16, %v824_v12  ;;  %v834_v21 = vadd.f32 %v999_v16, %v825_v8  ;;  %v835_v23 = vadd.f32 %v999_v16, %v826_v18 }
 0x7dd   :  { %v864_v24 = vpop.permute.xlu0 %863 }
 0x7de   :  { %vm836_vm0 = vcmp.ge.f32.partialorder %v832_v41, 0.0  ;;  %vm837_vm1 = vcmp.ge.f32.partialorder %v833_v20, 0.0  ;;  %vm838_vm2 = vcmp.ge.f32.partialorder %v834_v21, 0.0  ;;  %vm839_vm3 = vcmp.ge.f32.partialorder %v835_v23, 0.0  ;;  %1085 = vmatprep.subr.bf16.mxu0 %v864_v24 }
 0x7df   :  { %v840_v11 = vmul.f32 0.2, %v832_v41  ;;  %v841_v25 = vmul.f32 0.2, %v833_v20  ;;  %v842_v26 = vmul.f32 0.2, %v834_v21  ;;  %1086 = vmatpush3.bf16.msra.mxu0 %v864_v24 }
 0x7e0   :  { %v843_v35 = vmul.f32 0.2, %v835_v23  ;;  %1087 = vmatprep.subr.bf16.mxu0 %v866_v22 }
 0x7e1   :  { %v846_v37 = vsel %vm838_vm2, %v834_v21, %v842_v26  ;;  %v844_v28 = vsel %vm836_vm0, %v832_v41, %v840_v11  ;;  %v845_v39 = vsel %vm837_vm1, %v833_v20, %v841_v25  ;;  %v940_v52 = vpop.permute.xlu0 %939 }
 0x7e2   :  { %v847_v38 = vsel %vm839_vm3, %v835_v23, %v843_v35  ;;  %v850_v43 = vadd.f32 %v846_v37, %v288_v31  ;;  %v848_v40 = vadd.f32 %v844_v28, %v280_v33  ;;  %v849_v29 = vadd.f32 %v845_v39, %v283_v13 }
 0x7e3   :  { %v851_v27 = vadd.f32 %v847_v38, %v291_v36  ;;  %1088 = vmatpush3.bf16.msra.mxu0 %v866_v22 }
 0x7e4   :  { %v852_v46 = vpack.c.bf16 %v849_v29, %v848_v40 }
 0x7e5   :  { %v853_v42 = vpack.c.bf16 %v851_v27, %v850_v43 }
 0x7e6   :  { %1089 = vmatprep.mubr.msk.bf16.mxu0 %vm365_vm7, %v852_v46 }
 0x7e7   :  { %1090 = vmatmul.mubr.msk.bf16.vlgmr.msra.gmra.mrb[16].mxu0 %vm365_vm7, %v853_v42 }
 0x8ba   :  { %v1091_v47 = vpop.f32.mrb[16].mxu0 }
 0x8bb   :  { %v920_v49 = vadd.f32 %v1091_v47, %v1000_v14  ;;  %v911_v48 = vpop.f32.mrb[17].mxu0 }
 0x8bc   :  { %v912_v44 = vadd.f32 %v1000_v14, %v911_v48  ;;  %v1092_v34 = vpop.f32.mrb[18].mxu0 }
 0x8bd   :  { %vm928_vm4 = vcmp.ge.f32.partialorder %v920_v49, 0.0  ;;  %v932_v45 = vmul.f32 0.2, %v920_v49  ;;  %v923_v50 = vadd.f32 %v1092_v34, %v1000_v14  ;;  %v914_v51 = vpop.f32.mrb[19].mxu0 }
 0x8be   :  { %vm926_vm5 = vcmp.ge.f32.partialorder %v912_v44, 0.0  ;;  %v930_v53 = vmul.f32 0.2, %v912_v44  ;;  %v915_v54 = vadd.f32 %v1000_v14, %v914_v51 }
 0x8bf   :  { %vm929_vm6 = vcmp.ge.f32.partialorder %v923_v50, 0.0  ;;  %v933_v30 = vmul.f32 0.2, %v923_v50  ;;  %v936_v55 = vsel %vm928_vm4, %v920_v49, %v932_v45 }
 0x8c0   :  { %vm927_vm8 = vcmp.ge.f32.partialorder %v915_v54, 0.0  ;;  %v931_v56 = vmul.f32 0.2, %v915_v54  ;;  %v944_v32 = vmul.f32 %v940_v52, %v936_v55  ;;  %v934_v57 = vsel %vm926_vm5, %v912_v44, %v930_v53 }
 0x8c1   :  { %v942_v58 = vmul.f32 %v940_v52, %v934_v57  ;;  %v937_v63 = vsel %vm929_vm6, %v923_v50, %v933_v30 }
 0x8c2   :  { %v952_v59 = vsel %vm365_vm7, %v944_v32, 0.0  ;;  %v935_v60 = vsel %vm927_vm8, %v915_v54, %v931_v56  ;;  %v945_v3 = vmul.f32 %v940_v52, %v937_v63 }
 0x8c3   :  { %953 = vadd.xlane.f32.xlu0 %v952_v59  ;;  %v946_v61 = vsel %vm365_vm7, %v942_v58, 0.0  ;;  %v943_v62 = vmul.f32 %v940_v52, %v935_v60 }
 0x8c4   :  { %947 = vadd.xlane.f32.xlu1 %v946_v61  ;;  %v955_v5 = vsel %vm365_vm7, %v945_v3, 0.0 }
 0x8c5   :  { %v949_v2 = vsel %vm365_vm7, %v943_v62, 0.0 }
 0x8c7   :  { %950 = vadd.xlane.f32.xlu0 %v949_v2 }
 0x8cb   :  { %956 = vadd.xlane.f32.xlu0 %v955_v5 }
 0x950   :  { %v954_v6 = vpop.xlane.xlu0 %953 }
 0x951   :  { %961 = vst.msk [vmem:[%s1516_s5 + $0x10] sm:$0xff] %vm958_vm9, %v954_v6  ;;  %v948_v1 = vpop.xlane.xlu1 %947 }
 0x952   :  { %959 = vst.msk [vmem:[%s1516_s5] sm:$0xff] %vm958_vm9, %v948_v1 }
 0x954   :  { %v951_v4 = vpop.xlane.xlu0 %950 }
 0x955   :  { %960 = vst.msk [vmem:[%s1516_s5 + $0x8] sm:$0xff] %vm958_vm9, %v951_v4 }
 0x958   :  { %v957_v9 = vpop.xlane.xlu0 %956 }
 0x959   :  { %962 = vst.msk [vmem:[%s1516_s5 + $0x18] sm:$0xff] %vm958_vm9, %v957_v9 }

</bundles_post_ra>
